<compile_context>
chip_gen: v5e
topology: v5e:2x2
jax: 0.10.0
libtpu: 0.0.40
codegen_flags: <defaults>
</compile_context>

<pallas_src>
import functools

import jax
import jax.numpy as jnp
from jax.experimental import pallas as pl
from jax.experimental.pallas import tpu as pltpu

PACK = 16        # samples packed per 128-lane row (16 * 8 features = 128 lanes)
TR_MAX = 4096    # max packed rows per grid step (2 MiB f32 x-tile, <~20 MiB live VMEM)


def _round_up(n, m):
    return ((n + m - 1) // m) * m


def _mlp_kernel(x_ref, w1_ref, b1_ref, w2_ref, b2_ref, o_ref, *, matmul_dtype):
    # Cast matmul operands in-kernel only -- the HBM stream of x stays f32.
    x = x_ref[...].astype(matmul_dtype)
    # fc1 (block-diagonal packed): [TR, 128] @ [128, PACK*hid] -> f32 accumulate (MXU).
    h = jnp.dot(x, w1_ref[...], preferred_element_type=jnp.float32)
    # bias + sigmoid via the single-EUP tanh form (exp+recip = 2 EUP passes is slower).
    h = 0.5 * jnp.tanh(0.5 * (h + b1_ref[...])) + 0.5
    # fc2: [TR, PACK*hid] @ [PACK*hid, PACK*out] -> f32 accumulate (MXU).
    out = jnp.dot(h.astype(matmul_dtype), w2_ref[...],
                  preferred_element_type=jnp.float32)
    o_ref[...] = (out + b2_ref[...]).astype(o_ref.dtype)
    # TODO(synk): optional lane-dense relayout of the [TR, 32] result to [TR//4, 128]
    #             before the store (~5-10%, frees out-buffer VMEM); skipped to keep
    #             Mosaic lowering simple.


def smallnn_fhd_v3(x, w1, b1, w2, b2, *, matmul_dtype=jnp.bfloat16, tr_max=TR_MAX):
    """Forward pass of SmallNN_FHD_v3.

    x  : [B, in_dim]   (in_dim = total_clients * num_classes = 8)
    w1 : [in_dim, hid], b1 : [1, hid]   (hid = total_clients * d = 24)
    w2 : [hid, out],    b2 : [1, out]   (out = num_classes = 2)
    Weights are stored [in, out] (transposed vs. PyTorch), so y = x @ W + b.

    matmul_dtype: dtype of the MXU operands (accumulation is always f32).
      bf16 (default) keeps the kernel HBM-bound on v5e/v6e/v7x; pass jnp.float32
      for bit-for-bit f32 matmul semantics.
    """
    B, in_dim = x.shape
    hid = w1.shape[1]
    out_dim = w2.shape[1]
    assert PACK * in_dim == 128, "packing assumes in_dim * PACK == 128 lanes"

    # ---- lane-pack PACK samples per 128-lane row (contiguous => free reshape) ----
    # Pad only to the packing granularity (128 samples); common large batches that
    # are multiples of 128 incur zero copies.  Do NOT round up to the tile size.
    B_pad = _round_up(B, PACK * 8)
    x_pad = x if B_pad == B else jnp.pad(x, ((0, B_pad - B), (0, 0)))
    R = B_pad // PACK                                  # packed rows (multiple of 8)
    x_packed = x_pad.reshape(R, PACK * in_dim)         # free reshape; dtype unchanged

    # ---- block-diagonal weights: sample i's 8 lanes map to its own hid/out cols ----
    # KB-scale, built once; cast to the MXU operand dtype here (negligible HBM).
    eye = jnp.eye(PACK, dtype=jnp.float32)
    w1_big = jnp.kron(eye, w1.astype(jnp.float32)).astype(matmul_dtype)   # [128, PACK*hid]
    w2_big = jnp.kron(eye, w2.astype(jnp.float32)).astype(matmul_dtype)   # [PACK*hid, PACK*out]
    b1_big = jnp.tile(b1.astype(jnp.float32), (1, PACK))                  # [1, PACK*hid]
    b2_big = jnp.tile(b2.astype(jnp.float32), (1, PACK))                  # [1, PACK*out]

    # ---- batch tile: large enough to amortize per-step overhead, small enough to
    #      stay well inside VMEM, capped so the grid has ~4 steps (v7x 2-TC sharding).
    TR = max(8, min(tr_max, _round_up(pl.cdiv(R, 4), 8)))
    grid = (pl.cdiv(R, TR),)     # last block may be ragged; Pallas masks OOB stores

    x_bytes = jnp.dtype(x_packed.dtype).itemsize
    w_bytes = jnp.dtype(matmul_dtype).itemsize
    cost = pl.CostEstimate(
        flops=2 * R * (PACK * in_dim) * (PACK * hid)
              + 2 * R * (PACK * hid) * (PACK * out_dim),
        transcendentals=R * PACK * hid,
        bytes_accessed=(R * PACK * in_dim * x_bytes
                        + R * PACK * out_dim * 4
                        + (PACK * in_dim) * (PACK * hid) * w_bytes
                        + (PACK * hid) * (PACK * out_dim) * w_bytes
                        + (PACK * hid + PACK * out_dim) * 4),
    )

    out_packed = pl.pallas_call(
        functools.partial(_mlp_kernel, matmul_dtype=matmul_dtype),
        out_shape=jax.ShapeDtypeStruct((R, PACK * out_dim), jnp.float32),
        grid_spec=pltpu.PrefetchScalarGridSpec(
            num_scalar_prefetch=0,
            grid=grid,
            in_specs=[
                # x: batch-tiled, double-buffered by the Pallas pipeline
                pl.BlockSpec((TR, PACK * in_dim), lambda i: (i, 0)),
                # weights/biases: constant index_map -> fetched once, VMEM-resident
                pl.BlockSpec(w1_big.shape, lambda i: (0, 0)),
                pl.BlockSpec(b1_big.shape, lambda i: (0, 0)),
                pl.BlockSpec(w2_big.shape, lambda i: (0, 0)),
                pl.BlockSpec(b2_big.shape, lambda i: (0, 0)),
            ],
            out_specs=pl.BlockSpec((TR, PACK * out_dim), lambda i: (i, 0)),
        ),
        compiler_params=pltpu.CompilerParams(
            dimension_semantics=("parallel",),      # megacore / v7x 2-TC sharding
            vmem_limit_bytes=40 * 1024 * 1024,      # headroom even on v7x (64 MiB/TC)
        ),
        cost_estimate=cost,
    )(x_packed, w1_big, b1_big, w2_big, b2_big)

    # ---- unpack: [R, PACK*out] -> [B_pad, out] -> [B, out] (free reshape + slice) ----
    return out_packed.reshape(B_pad, out_dim)[:B]


def init_params(key, d=6, total_clients=4, num_classes=2, dtype=jnp.float32):
    """PyTorch-Linear-style init: uniform(-1/sqrt(fan_in), 1/sqrt(fan_in))."""
    in1 = total_clients * num_classes      # 8
    hid = total_clients * d                # 24
    out = num_classes                      # 2
    k1, k2, k3, k4 = jax.random.split(key, 4)
    bound1 = 1.0 / jnp.sqrt(in1)
    bound2 = 1.0 / jnp.sqrt(hid)
    # stored [in, out] (transposed relative to PyTorch's [out, in])
    w1 = jax.random.uniform(k1, (in1, hid), dtype, -bound1, bound1)
    b1 = jax.random.uniform(k2, (1, hid), dtype, -bound1, bound1)
    w2 = jax.random.uniform(k3, (hid, out), dtype, -bound2, bound2)
    b2 = jax.random.uniform(k4, (1, out), dtype, -bound2, bound2)
    return w1, b1, w2, b2


def reference(x, w1, b1, w2, b2):
    h = jax.nn.sigmoid(x @ w1 + b1)
    return h @ w2 + b2


if __name__ == "__main__":
    key = jax.random.PRNGKey(0)
    kx, kp = jax.random.split(key)

    total_clients, num_classes, d = 4, 2, 6
    in_dim = total_clients * num_classes     # 8
    B = 200                                  # not a multiple of 128 -> exercises tail pad + 2-step grid

    x = jax.random.normal(kx, (B, in_dim), jnp.float32)
    w1, b1, w2, b2 = init_params(kp, d=d, total_clients=total_clients,
                                 num_classes=num_classes)
    ref = reference(x, w1, b1, w2, b2)

    # exact-semantics path: f32 MXU operands (tight tolerance)
    out_f32 = jax.block_until_ready(
        smallnn_fhd_v3(x, w1, b1, w2, b2, matmul_dtype=jnp.float32))
    assert out_f32.shape == (B, num_classes), out_f32.shape
    assert jnp.allclose(out_f32, ref, atol=1e-5, rtol=1e-5), \
        float(jnp.max(jnp.abs(out_f32 - ref)))

    # default perf path: f32 HBM stream, bf16 MXU operands, f32 accumulate/bias/sigmoid
    out_bf16 = jax.block_until_ready(smallnn_fhd_v3(x, w1, b1, w2, b2))
    assert out_bf16.shape == (B, num_classes), out_bf16.shape
    assert jnp.allclose(out_bf16, ref, atol=5e-2, rtol=5e-2), \
        float(jnp.max(jnp.abs(out_bf16 - ref)))

    print("KERNEL_OK")
</pallas_src>

<mosaic_0001>
module attributes {stable_mosaic.version = 11 : i64} {
  func.func @_mlp_kernel(%arg0: i32, %arg1: memref<8x128xf32, #tpu.memory_space<vmem>>, %arg2: memref<128x384xf32, #tpu.memory_space<vmem>>, %arg3: memref<1x384xf32, #tpu.memory_space<vmem>>, %arg4: memref<384x32xf32, #tpu.memory_space<vmem>>, %arg5: memref<1x32xf32, #tpu.memory_space<vmem>>, %arg6: memref<8x32xf32, #tpu.memory_space<vmem>>) attributes {dimension_semantics = [#tpu.dimension_semantics<parallel>], iteration_bounds = array<i64: 2>, scalar_prefetch = 0 : i64, scratch_operands = 0 : i64, tpu.core_type = #tpu.core_type<tc>, window_params = [{transform_indices = @transform_0, window_bounds = array<i64: 8, 128>}, {pipeline_mode = #tpu.pipeline_mode<synchronous>, transform_indices = @transform_1, window_bounds = array<i64: 128, 384>}, {pipeline_mode = #tpu.pipeline_mode<synchronous>, transform_indices = @transform_2, window_bounds = array<i64: 1, 384>}, {pipeline_mode = #tpu.pipeline_mode<synchronous>, transform_indices = @transform_3, window_bounds = array<i64: 384, 32>}, {pipeline_mode = #tpu.pipeline_mode<synchronous>, transform_indices = @transform_4, window_bounds = array<i64: 1, 32>}, {transform_indices = @transform_5, window_bounds = array<i64: 8, 32>}]} {
    %c0 = arith.constant 0 : index
    %c0_0 = arith.constant 0 : index
    %0 = vector.load %arg1[%c0, %c0_0] : memref<8x128xf32, #tpu.memory_space<vmem>>, vector<8x128xf32>
    %c0_1 = arith.constant 0 : index
    %c0_2 = arith.constant 0 : index
    %1 = vector.load %arg2[%c0_1, %c0_2] : memref<128x384xf32, #tpu.memory_space<vmem>>, vector<128x384xf32>
    %cst = arith.constant dense<0.000000e+00> : vector<8x384xf32>
    %2 = tpu.matmul %0, %1, %cst {dimension_numbers = #tpu.dot_dimension_numbers<[1], [0], [0], [1], [0, 0, 1, 1], [], []>} : vector<8x128xf32>, vector<128x384xf32>, vector<8x384xf32> -> vector<8x384xf32>
    %c0_3 = arith.constant 0 : index
    %c0_4 = arith.constant 0 : index
    %3 = vector.load %arg3[%c0_3, %c0_4] : memref<1x384xf32, #tpu.memory_space<vmem>>, vector<1x384xf32>
    %4 = vector.broadcast %3 : vector<1x384xf32> to vector<8x384xf32>
    %5 = arith.addf %2, %4 : vector<8x384xf32>
    %cst_5 = arith.constant 5.000000e-01 : f32
    %6 = vector.broadcast %cst_5 : f32 to vector<8x384xf32>
    %7 = arith.mulf %6, %5 : vector<8x384xf32>
    %8 = math.tanh %7 : vector<8x384xf32>
    %cst_6 = arith.constant 5.000000e-01 : f32
    %9 = vector.broadcast %cst_6 : f32 to vector<8x384xf32>
    %10 = arith.mulf %9, %8 : vector<8x384xf32>
    %cst_7 = arith.constant 5.000000e-01 : f32
    %11 = vector.broadcast %cst_7 : f32 to vector<8x384xf32>
    %12 = arith.addf %10, %11 : vector<8x384xf32>
    %c0_8 = arith.constant 0 : index
    %c0_9 = arith.constant 0 : index
    %13 = vector.load %arg4[%c0_8, %c0_9] : memref<384x32xf32, #tpu.memory_space<vmem>>, vector<384x32xf32>
    %cst_10 = arith.constant dense<0.000000e+00> : vector<8x32xf32>
    %14 = tpu.matmul %12, %13, %cst_10 {dimension_numbers = #tpu.dot_dimension_numbers<[1], [0], [0], [1], [0, 0, 1, 1], [], []>} : vector<8x384xf32>, vector<384x32xf32>, vector<8x32xf32> -> vector<8x32xf32>
    %c0_11 = arith.constant 0 : index
    %c0_12 = arith.constant 0 : index
    %15 = vector.load %arg5[%c0_11, %c0_12] : memref<1x32xf32, #tpu.memory_space<vmem>>, vector<1x32xf32>
    %16 = vector.broadcast %15 : vector<1x32xf32> to vector<8x32xf32>
    %17 = arith.addf %14, %16 : vector<8x32xf32>
    %c0_13 = arith.constant 0 : index
    %c0_14 = arith.constant 0 : index
    %18 = vector.load %arg6[%c0_13, %c0_14] : memref<8x32xf32, #tpu.memory_space<vmem>>, vector<8x32xf32>
    tpu.vector_store %arg6[%c0_13, %c0_14], %17 {strides = array<i32>} : memref<8x32xf32, #tpu.memory_space<vmem>>, vector<8x32xf32>,
    return
  }
  func.func @transform_0(%arg0: i32) -> (i32, i32) {
    %c0_i32 = arith.constant 0 : i32
    %c0_i32_0 = arith.constant 0 : i32
    return %arg0, %c0_i32 : i32, i32
  }
  func.func @transform_1(%arg0: i32) -> (i32, i32) {
    %c0_i32 = arith.constant 0 : i32
    %c0_i32_0 = arith.constant 0 : i32
    %c0_i32_1 = arith.constant 0 : i32
    return %c0_i32, %c0_i32_0 : i32, i32
  }
  func.func @transform_2(%arg0: i32) -> (i32, i32) {
    %c0_i32 = arith.constant 0 : i32
    %c0_i32_0 = arith.constant 0 : i32
    %c0_i32_1 = arith.constant 0 : i32
    return %c0_i32, %c0_i32_0 : i32, i32
  }
  func.func @transform_3(%arg0: i32) -> (i32, i32) {
    %c0_i32 = arith.constant 0 : i32
    %c0_i32_0 = arith.constant 0 : i32
    %c0_i32_1 = arith.constant 0 : i32
    return %c0_i32, %c0_i32_0 : i32, i32
  }
  func.func @transform_4(%arg0: i32) -> (i32, i32) {
    %c0_i32 = arith.constant 0 : i32
    %c0_i32_0 = arith.constant 0 : i32
    %c0_i32_1 = arith.constant 0 : i32
    return %c0_i32, %c0_i32_0 : i32, i32
  }
  func.func @transform_5(%arg0: i32) -> (i32, i32) {
    %c0_i32 = arith.constant 0 : i32
    %c0_i32_0 = arith.constant 0 : i32
    return %arg0, %c0_i32 : i32, i32
  }
}

</mosaic_0001>

<bundles_post_ra>
// kernel: tpu_custom_call.1
= control target key start
LH: loop header
LB: loop body
LE: loop exit
PB: predicated region body
PF: predicated region fallthrough
CT: control target
= control target key end

     0   :  { %10 = vsyncpa [#allocation3], 0  ;;  %s1072_s0 = inlined_call_operand.vmem [shape: f32[16,128], index: 0, kind: input, shape index: {}]   ;;  %s1073_s1 = inlined_call_operand.vmem [shape: f32[128,384], index: 1, kind: input, shape index: {}]   ;;  %s1074_s2 = inlined_call_operand.vmem [shape: f32[1,384], index: 2, kind: input, shape index: {}]   ;;  %s1075_s3 = inlined_call_operand.vmem [shape: f32[384,32], index: 3, kind: input, shape index: {}]   ;;  %s1076_s4 = inlined_call_operand.vmem [shape: f32[1,32], index: 4, kind: input, shape index: {}]   ;;  %s1077_s5 = inlined_call_operand.hbm [shape: f32[16,32], index: 5, kind: output, shape index: {}]  }
   0x1   :  { %12 = vsyncpa [#allocation3 + $0x1], 0  ;;  %s688_s18 = smov 0   ;;  %s690_s19 = smov 0  }
   0x2   :  { %s692_s20 = smov 0   ;;  %s694_s21 = smov 0  }
   0x3 LB: > { %s709_s22 = sadd.s32 4294967295, %s656_s21   ;;  %s538_s23 = sadd.s32 4294967294, %s656_s21   ;;  %s656_s21 = sphi %s694_s21, %s1083_s21   ;;  %s652_s20 = sphi %s692_s20, %s1082_s20   ;;  %s648_s19 = sphi %s690_s19, %s1081_s19   ;;  %s644_s18 = sphi %s688_s18, %s1080_s18  }
   0x4   : > { %s713_s24 = sadd.s32 1, %s656_s21   ;;  %s135_s25 = sadd.s32 1, %s652_s20 }
   0x5   : > { %s132_s26 = ssub.s32 %s656_s21, %s713_s24  ;;  %p145_p0 = scmp.ne.s32.totalorder %s652_s20, %s648_s19 }
   0x6   : > { %p133_p1 = scmp.eq.s32.totalorder %s132_s26, 0  ;;  %p146_p2 = scmp.eq.s32.totalorder %s709_s22, 1 }
   0x7   : > { %p151_p3 = scmp.ne.s32.totalorder %s648_s19, %s644_s18  ;;  %p152_p4 = scmp.eq.s32.totalorder %s538_s23, 1 }
   0x8   : > { %s724_s27 = scalar_select %p133_p1, %s652_s20, %s135_s25  }
   0x9   : > { %p726_p5 = por %p146_p2, %p145_p0  ;;  %p730_p6 = por %p152_p4, %p151_p3 }
   0xa   : > { %p541_p7 = scmp.ge.s32.totalorder %s656_s21, 1  ;;  %p189_p8 = scmp.lt.s32.totalorder %s656_s21, 3 }
   0xc   : > { %p190_p9 = pnand %p541_p7, %p189_p8 }
   0xd   : > { %p216_p10 = scmp.lt.s32.totalorder (!%p190_p9), %s709_s22, 1  ;;  %s213_s14 = sand.u32 (!%p190_p9), 1, %s648_s19  }
   0xe   : > { %193 = sbr.rel (%p190_p9) target bundleno = 333 (0x14d), region = 40  ;;  %s542_s15 = sshll.u32 (!%p190_p9), %s213_s14, 3 }
   0xf   : > { %s545_s16 = sshll.u32 (!%p190_p9), %s709_s22, 3  ;;  %s215_s26 = scalar_lea.vmem (!%p190_p9), [#allocation2], %s542_s15 }
  0x10   : > { %s476_s30 = sshll.u32 (!%p190_p9), %s215_s26, 4  ;;  %s614_s13 = scalar_lea.hbm (!%p190_p9), %s1077_s5, 16  ;;  %s477_s30 = int_to_ptr.vmem [resolvable:$true] %s476_s30 }
  0x13   : > { %v266_v0 = vld [vmem:[%s1073_s1 + $0x168] sm:$0xff]  ;;  %v263_v1 = vld [vmem:[%s1073_s1 + $0x150] sm:$0xff]  ;;  %v268_v2 = vld [vmem:[%s1073_s1 + $0x178] sm:$0xff]  ;;  %s842_s9 = scalar_select %p216_p10, %s709_s22, 1  ;;  %vm461_vm0 = vcmask 261120  }
  0x14   : > { %277 = vmatpush.msra.mxu0 %v266_v0  ;;  %v265_v3 = vld [vmem:[%s1073_s1 + $0x160] sm:$0xff]  ;;  %v260_v4 = vld [vmem:[%s1073_s1 + $0x138] sm:$0xff]  ;;  %317 = vmatpush.msra.mxu2 %v268_v2  ;;  %v267_v5 = vld [vmem:[%s1073_s1 + $0x170] sm:$0xff]  ;;  %s464_s22 = scalar_lea.sflag [#allocation3], %s213_s14 }
  0x15   : > { %297 = vmatpush.msra.mxu1 %v267_v5  ;;  %v262_v6 = vld [vmem:[%s1073_s1 + $0x148] sm:$0xff]  ;;  %v264_v7 = vld [vmem:[%s1073_s1 + $0x158] sm:$0xff]  ;;  %v257_v8 = vld [vmem:[%s1073_s1 + $0x120] sm:$0xff]  ;;  %s543_s11 = sshll.u32 %s842_s9, 3  ;;  %s474_s9 = scalar_lea.hbm %s1077_s5, %s545_s16 }
  0x16   : > { %278 = vmatpush.msra.mxu0 %v263_v1  ;;  %318 = vmatpush.msra.mxu2 %v265_v3  ;;  %v261_v9 = vld [vmem:[%s1073_s1 + $0x140] sm:$0xff]  ;;  %v259_v10 = vld [vmem:[%s1073_s1 + $0x130] sm:$0xff]  ;;  %v254_v11 = vld [vmem:[%s1073_s1 + $0x108] sm:$0xff]  ;;  %s219_s10 = scalar_lea.vmem %s1072_s0, %s543_s11  ;;  %s478_s6 = sshll.u32 %s474_s9, 4  ;;  %s479_s6 = int_to_ptr.hbm [resolvable:$true] %s478_s6 }
  0x17   : > { %298 = vmatpush.msra.mxu1 %v264_v7  ;;  %v258_v12 = vld [vmem:[%s1073_s1 + $0x128] sm:$0xff]  ;;  %v256_v13 = vld [vmem:[%s1073_s1 + $0x118] sm:$0xff]  ;;  %v251_v14 = vld [vmem:[%s1073_s1 + $0xf0] sm:$0xff]  ;;  %s608_s7 = sshra.s32 %s479_s6, 4  ;;  %s609_s7 = int_to_ptr.hbm [resolvable:$true] %s608_s7 }
  0x18   : > { %279 = vmatpush.msra.mxu0 %v260_v4  ;;  %319 = vmatpush.msra.mxu2 %v262_v6  ;;  %v255_v15 = vld [vmem:[%s1073_s1 + $0x110] sm:$0xff]  ;;  %v253_v16 = vld [vmem:[%s1073_s1 + $0x100] sm:$0xff]  ;;  %v248_v17 = vld [vmem:[%s1073_s1 + $0xd8] sm:$0xff]  ;;  %s610_s8 = scalar_lea.hbm %s609_s7, 8  ;;  %p615_p0 = scmp.lt.s32.totalorder %s609_s7, %s1077_s5 }
  0x19   : > { %299 = vmatpush.msra.mxu1 %v261_v9  ;;  %v252_v18 = vld [vmem:[%s1073_s1 + $0xf8] sm:$0xff]  ;;  %v250_v19 = vld [vmem:[%s1073_s1 + $0xe8] sm:$0xff]  ;;  %v245_v20 = vld [vmem:[%s1073_s1 + $0xc0] sm:$0xff]  ;;  %p611_p11 = scmp.ne.s32.totalorder %s609_s7, %s610_s8  ;;  %p616_p1 = scmp.lt.s32.totalorder %s614_s13, %s610_s8 }
  0x1a   : > { %280 = vmatpush.msra.mxu0 %v257_v8  ;;  %320 = vmatpush.msra.mxu2 %v259_v10  ;;  %v249_v21 = vld [vmem:[%s1073_s1 + $0xe0] sm:$0xff]  ;;  %v247_v22 = vld [vmem:[%s1073_s1 + $0xd0] sm:$0xff]  ;;  %v242_v23 = vld [vmem:[%s1073_s1 + $0xa8] sm:$0xff] }
  0x1b   : > { %300 = vmatpush.msra.mxu1 %v258_v12  ;;  %v246_v24 = vld [vmem:[%s1073_s1 + $0xc8] sm:$0xff]  ;;  %v244_v25 = vld [vmem:[%s1073_s1 + $0xb8] sm:$0xff]  ;;  %v239_v26 = vld [vmem:[%s1073_s1 + $0x90] sm:$0xff]  ;;  %p612_p12 = pnand %p611_p11, %p726_p5  ;;  %p617_p2 = por %p616_p1, %p615_p0 }
  0x1c   : > { %281 = vmatpush.msra.mxu0 %v254_v11  ;;  %321 = vmatpush.msra.mxu2 %v256_v13  ;;  %v243_v27 = vld [vmem:[%s1073_s1 + $0xb0] sm:$0xff]  ;;  %v364_v28 = vld [vmem:[%s1075_s3 + $0x78] sm:$0xff]  ;;  %v241_v29 = vld [vmem:[%s1073_s1 + $0xa0] sm:$0xff] }
  0x1d   : > { %301 = vmatpush.msra.mxu1 %v255_v15  ;;  %v363_v30 = vld [vmem:[%s1075_s3 + $0x70] sm:$0xff]  ;;  %v236_v31 = vld [vmem:[%s1073_s1 + $0x78] sm:$0xff]  ;;  %401 = vmatpush.msra.mxu3 %v364_v28  ;;  %v238_v33 = vld [vmem:[%s1073_s1 + $0x88] sm:$0xff]  ;;  %p613_p13 = pneg %p612_p12 }
  0x1e   : > { %282 = vmatpush.msra.mxu0 %v251_v14  ;;  %322 = vmatpush.msra.mxu2 %v253_v16  ;;  %v240_v32 = vld [vmem:[%s1073_s1 + $0x98] sm:$0xff]  ;;  %v362_v34 = vld [vmem:[%s1075_s3 + $0x68] sm:$0xff]  ;;  %v233_v35 = vld [vmem:[%s1073_s1 + $0x60] sm:$0xff] }
  0x1f   : > { %302 = vmatpush.msra.mxu1 %v252_v18  ;;  %v237_v36 = vld [vmem:[%s1073_s1 + $0x80] sm:$0xff]  ;;  %402 = vmatpush.msra.mxu3 %v363_v30  ;;  %v235_v37 = vld [vmem:[%s1073_s1 + $0x70] sm:$0xff]  ;;  %v230_v39 = vld [vmem:[%s1073_s1 + $0x48] sm:$0xff]  ;;  %p618_p3 = pnand %p617_p2, %p613_p13 }
  0x20   : > { %283 = vmatpush.msra.mxu0 %v248_v17  ;;  %323 = vmatpush.msra.mxu2 %v250_v19  ;;  %v361_v38 = vld [vmem:[%s1075_s3 + $0x60] sm:$0xff]  ;;  %v234_v40 = vld [vmem:[%s1073_s1 + $0x68] sm:$0xff]  ;;  %v232_v41 = vld [vmem:[%s1073_s1 + $0x58] sm:$0xff] }
  0x21   : > { %303 = vmatpush.msra.mxu1 %v249_v21  ;;  %403 = vmatpush.msra.mxu3 %v362_v34  ;;  %v360_v42 = vld [vmem:[%s1075_s3 + $0x58] sm:$0xff]  ;;  %v227_v43 = vld [vmem:[%s1073_s1 + $0x30] sm:$0xff]  ;;  %v229_v45 = vld [vmem:[%s1073_s1 + $0x40] sm:$0xff] }
  0x22   : > { %284 = vmatpush.msra.mxu0 %v245_v20  ;;  %324 = vmatpush.msra.mxu2 %v247_v22  ;;  %v231_v44 = vld [vmem:[%s1073_s1 + $0x50] sm:$0xff]  ;;  %v224_v47 = vld [vmem:[%s1073_s1 + $0x18] sm:$0xff]  ;;  %v226_v49 = vld [vmem:[%s1073_s1 + $0x28] sm:$0xff] }
  0x23   : > { %304 = vmatpush.msra.mxu1 %v246_v24  ;;  %404 = vmatpush.msra.mxu3 %v361_v38  ;;  %v359_v46 = vld [vmem:[%s1075_s3 + $0x50] sm:$0xff]  ;;  %v228_v48 = vld [vmem:[%s1073_s1 + $0x38] sm:$0xff]  ;;  %v358_v50 = vld [vmem:[%s1075_s3 + $0x48] sm:$0xff] }
  0x24   : > { %285 = vmatpush.msra.mxu0 %v242_v23  ;;  %325 = vmatpush.msra.mxu2 %v244_v25  ;;  %v221_v51 = vld [vmem:[%s1073_s1] sm:$0xff]  ;;  %v223_v54 = vld [vmem:[%s1073_s1 + $0x10] sm:$0xff]  ;;  %v222_v55 = vld [vmem:[%s1073_s1 + $0x8] sm:$0xff] }
  0x25   : > { %305 = vmatpush.msra.mxu1 %v243_v27  ;;  %405 = vmatpush.msra.mxu3 %v360_v42  ;;  %v225_v52 = vld [vmem:[%s1073_s1 + $0x20] sm:$0xff]  ;;  %v380_v56 = vld [vmem:[%s1075_s3 + $0xf8] sm:$0xff]  ;;  %v379_v59 = vld [vmem:[%s1075_s3 + $0xf0] sm:$0xff] }
  0x26   : > { %286 = vmatpush.msra.mxu0 %v239_v26  ;;  %326 = vmatpush.msra.mxu2 %v241_v29  ;;  %v220_v53 = vld [vmem:[%s219_s10] sm:$0xff]  ;;  %v396_v57 = vld [vmem:[%s1075_s3 + $0x178] sm:$0xff]  ;;  %v395_v60 = vld [vmem:[%s1075_s3 + $0x170] sm:$0xff] }
  0x27   : > { %306 = vmatpush.msra.mxu1 %v240_v32  ;;  %406 = vmatpush.msra.mxu3 %v359_v46  ;;  %v357_v58 = vld [vmem:[%s1075_s3 + $0x40] sm:$0xff]  ;;  %v378_v61 = vld [vmem:[%s1075_s3 + $0xe8] sm:$0xff]  ;;  %v356_v0 = vld [vmem:[%s1075_s3 + $0x38] sm:$0xff] }
  0x28   : > { %287 = vmatpush.msra.mxu0 %v236_v31  ;;  %327 = vmatpush.msra.mxu2 %v238_v33  ;;  %v394_v62 = vld [vmem:[%s1075_s3 + $0x168] sm:$0xff]  ;;  %v377_v63 = vld [vmem:[%s1075_s3 + $0xe0] sm:$0xff]  ;;  %v376_v1 = vld [vmem:[%s1075_s3 + $0xd8] sm:$0xff] }
  0x29   : > { %307 = vmatpush.msra.mxu1 %v237_v36  ;;  %407 = vmatpush.msra.mxu3 %v358_v50  ;;  %v393_v2 = vld [vmem:[%s1075_s3 + $0x160] sm:$0xff]  ;;  %v355_v3 = vld [vmem:[%s1075_s3 + $0x30] sm:$0xff]  ;;  %v392_v5 = vld [vmem:[%s1075_s3 + $0x158] sm:$0xff] }
  0x2a   : > { %288 = vmatpush.msra.mxu0 %v233_v35  ;;  %328 = vmatpush.msra.mxu2 %v235_v37  ;;  %v375_v4 = vld [vmem:[%s1075_s3 + $0xd0] sm:$0xff]  ;;  %v354_v6 = vld [vmem:[%s1075_s3 + $0x28] sm:$0xff]  ;;  %v353_v9 = vld [vmem:[%s1075_s3 + $0x20] sm:$0xff] }
  0x2b   : > { %308 = vmatpush.msra.mxu1 %v234_v40  ;;  %408 = vmatpush.msra.mxu3 %v357_v58  ;;  %v374_v7 = vld [vmem:[%s1075_s3 + $0xc8] sm:$0xff]  ;;  %v391_v8 = vld [vmem:[%s1075_s3 + $0x150] sm:$0xff]  ;;  %v373_v10 = vld [vmem:[%s1075_s3 + $0xc0] sm:$0xff] }
  0x2c   : > { %289 = vmatpush.msra.mxu0 %v230_v39  ;;  %329 = vmatpush.msra.mxu2 %v232_v41  ;;  %v390_v11 = vld [vmem:[%s1075_s3 + $0x148] sm:$0xff]  ;;  %v352_v12 = vld [vmem:[%s1075_s3 + $0x18] sm:$0xff]  ;;  %v389_v14 = vld [vmem:[%s1075_s3 + $0x140] sm:$0xff] }
  0x2d   : > { %309 = vmatpush.msra.mxu1 %v231_v44  ;;  %409 = vmatpush.msra.mxu3 %v356_v0  ;;  %v372_v13 = vld [vmem:[%s1075_s3 + $0xb8] sm:$0xff]  ;;  %v351_v15 = vld [vmem:[%s1075_s3 + $0x10] sm:$0xff]  ;;  %v350_v18 = vld [vmem:[%s1075_s3 + $0x8] sm:$0xff] }
  0x2e   : > { %290 = vmatpush.msra.mxu0 %v227_v43  ;;  %330 = vmatpush.msra.mxu2 %v229_v45  ;;  %v371_v16 = vld [vmem:[%s1075_s3 + $0xb0] sm:$0xff]  ;;  %v388_v17 = vld [vmem:[%s1075_s3 + $0x138] sm:$0xff]  ;;  %v370_v19 = vld [vmem:[%s1075_s3 + $0xa8] sm:$0xff] }
  0x2f   : > { %310 = vmatpush.msra.mxu1 %v228_v48  ;;  %410 = vmatpush.msra.mxu3 %v355_v3  ;;  %v387_v20 = vld [vmem:[%s1075_s3 + $0x130] sm:$0xff]  ;;  %v349_v21 = vld [vmem:[%s1075_s3] sm:$0xff]  ;;  %v386_v23 = vld [vmem:[%s1075_s3 + $0x128] sm:$0xff] }
  0x30   : > { %291 = vmatpush.msra.mxu0 %v224_v47  ;;  %331 = vmatpush.msra.mxu2 %v226_v49  ;;  %v369_v22 = vld [vmem:[%s1075_s3 + $0xa0] sm:$0xff]  ;;  %v368_v24 = vld [vmem:[%s1075_s3 + $0x98] sm:$0xff]  ;;  %v367_v26 = vld [vmem:[%s1075_s3 + $0x90] sm:$0xff] }
  0x31   : > { %311 = vmatpush.msra.mxu1 %v225_v52  ;;  %411 = vmatpush.msra.mxu3 %v354_v6  ;;  %v385_v25 = vld [vmem:[%s1075_s3 + $0x120] sm:$0xff]  ;;  %v384_v27 = vld [vmem:[%s1075_s3 + $0x118] sm:$0xff]  ;;  %v366_v28 = vld [vmem:[%s1075_s3 + $0x88] sm:$0xff] }
  0x32   : > { %292 = vmatpush.msra.mxu0 %v221_v51  ;;  %332 = vmatpush.msra.mxu2 %v223_v54  ;;  %v383_v29 = vld [vmem:[%s1075_s3 + $0x110] sm:$0xff]  ;;  %v365_v30 = vld [vmem:[%s1075_s3 + $0x80] sm:$0xff]  ;;  %v382_v31 = vld [vmem:[%s1075_s3 + $0x108] sm:$0xff] }
  0x33   : > { %293 = vmatmul.f32.vlgmr.msra.gmra.mxu0 %v220_v53  ;;  %333 = vmatmul.f32.vlgmr.msra.gmra.mxu2 %v220_v53  ;;  %v381_v32 = vld [vmem:[%s1075_s3 + $0x100] sm:$0xff] }
  0x34   : > { %312 = vmatpush.msra.mxu1 %v222_v55  ;;  %421 = vmatpush.msrb.mxu0 %v380_v56  ;;  %v269_v33 = vld [vmem:[%s1074_s2] sm:$0x7] }
  0x35   : > { %313 = vmatmul.f32.vlgmr.msra.gmra.mxu1 %v220_v53  ;;  %412 = vmatpush.msra.mxu3 %v353_v9  ;;  %v271_v34 = vperm.slane %v269_v33, 0  ;;  %v272_v35 = vperm.slane %v269_v33, 1  ;;  %v273_v41 = vperm.slane %v269_v33, 2  ;;  %v587_v55 = vld [vmem:[%s1076_s4] ss:$0 sm:$0xff] }
  0x36   : > { %441 = vmatpush.msrb.mxu1 %v396_v57  ;;  %422 = vmatpush.msrb.mxu0 %v379_v59 }
  0x37   : > { %413 = vmatpush.msra.mxu3 %v352_v12 }
  0x38   : > { %442 = vmatpush.msrb.mxu1 %v395_v60  ;;  %423 = vmatpush.msrb.mxu0 %v378_v61 }
  0x39   : > { %414 = vmatpush.msra.mxu3 %v351_v15 }
  0x3a   : > { %443 = vmatpush.msrb.mxu1 %v394_v62  ;;  %424 = vmatpush.msrb.mxu0 %v377_v63 }
  0x3b   : > { %415 = vmatpush.msra.mxu3 %v350_v18 }
  0x3c   : > { %425 = vmatpush.msrb.mxu0 %v376_v1  ;;  %444 = vmatpush.msrb.mxu1 %v393_v2 }
  0x3d   : > { %416 = vmatpush.msra.mxu3 %v349_v21 }
  0x3e   : > { %426 = vmatpush.msrb.mxu0 %v375_v4  ;;  %445 = vmatpush.msrb.mxu1 %v392_v5 }
  0x40   : > { %427 = vmatpush.msrb.mxu0 %v374_v7  ;;  %446 = vmatpush.msrb.mxu1 %v391_v8 }
  0x42   : > { %428 = vmatpush.msrb.mxu0 %v373_v10  ;;  %447 = vmatpush.msrb.mxu1 %v390_v11 }
  0x44   : > { %429 = vmatpush.msrb.mxu0 %v372_v13  ;;  %448 = vmatpush.msrb.mxu1 %v389_v14 }
  0x46   : > { %430 = vmatpush.msrb.mxu0 %v371_v16  ;;  %449 = vmatpush.msrb.mxu1 %v388_v17 }
  0x48   : > { %431 = vmatpush.msrb.mxu0 %v370_v19  ;;  %450 = vmatpush.msrb.mxu1 %v387_v20 }
  0x4a   : > { %432 = vmatpush.msrb.mxu0 %v369_v22  ;;  %451 = vmatpush.msrb.mxu1 %v386_v23 }
  0x4c   : > { %433 = vmatpush.msrb.mxu0 %v368_v24  ;;  %452 = vmatpush.msrb.mxu1 %v385_v25 }
  0x4e   : > { %434 = vmatpush.msrb.mxu0 %v367_v26  ;;  %453 = vmatpush.msrb.mxu1 %v384_v27 }
  0x50   : > { %435 = vmatpush.msrb.mxu0 %v366_v28  ;;  %454 = vmatpush.msrb.mxu1 %v383_v29 }
  0x52   : > { %436 = vmatpush.msrb.mxu0 %v365_v30  ;;  %455 = vmatpush.msrb.mxu1 %v382_v31 }
  0x54   : > { %456 = vmatpush.msrb.mxu1 %v381_v32 }
  0xb0   : > { %v294_v36 = vpop.f32.mrf.mxu0 }
  0xb1   : > { %v295_v37 = vadd.f32 %v294_v36, %v271_v34 }
  0xb2   : > { %v314_v38 = vpop.f32.mrf.mxu1 }
  0xb3   : > { %v337_v39 = vmul.f32 0.5, %v295_v37  ;;  %v315_v40 = vadd.f32 %v314_v38, %v272_v35 }
  0xb5   : > { %588 = vtanh.f32 %v337_v39  ;;  %v338_v42 = vmul.f32 0.5, %v315_v40 }
  0xb6   : > { %v334_v43 = vpop.f32.mrf.mxu2 }
  0xb7   : > { %590 = vtanh.f32 %v338_v42  ;;  %v335_v44 = vadd.f32 %v334_v43, %v273_v41 }
  0xb9   : > { %v339_v45 = vmul.f32 0.5, %v335_v44 }
  0xbb   : > { %v589_v46 = vpop.eup %588  ;;  %592 = vtanh.f32 %v339_v45 }
  0xbc   : > { %v343_v47 = vmul.f32 0.5, %v589_v46 }
  0xbd   : > { %v591_v48 = vpop.eup %590 }
  0xbe   : > { %v344_v49 = vmul.f32 0.5, %v591_v48  ;;  %v346_v50 = vadd.f32 0.5, %v343_v47 }
  0xc0   : > { %v347_v51 = vadd.f32 0.5, %v344_v49  ;;  %417 = vmatmul.f32.vlgmr.msra.gmra.mxu3 %v346_v50 }
  0xc1   : > { %v593_v52 = vpop.eup %592 }
  0xc2   : > { %437 = vmatmul.f32.vlgmr.msrb.gmra.mxu0 %v347_v51  ;;  %v345_v53 = vmul.f32 0.5, %v593_v52 }
  0xc4   : > { %v348_v54 = vadd.f32 0.5, %v345_v53 }
  0xc6   : > { %457 = vmatmul.f32.vlgmr.msrb.gmra.mxu1 %v348_v54 }
 0x13f   : > { %v438_v57 = vpop.f32.mrf.mxu0 }
 0x143   : > { %v418_v56 = vpop.f32.mrf.mxu3  ;;  %v458_v59 = vpop.f32.mrf.mxu1 }
 0x144   : > { %v419_v58 = vadd.f32 %v587_v55, %v418_v56 }
 0x146   : > { %v439_v60 = vadd.f32 %v438_v57, %v419_v58 }
 0x148   : > { %v459_v61 = vadd.f32 %v458_v59, %v439_v60 }
 0x14a   : > { %462 = vst.msk [vmem:[%s215_s26] sm:$0xff] %vm461_vm0, %v459_v61 }
 0x14b   : > { %621 = shalt.err (!%p618_p3)
}
 0x14c   : > { %548 = dma.vmem_to_hbm [thread:$0]  (%p726_p5), %s477_s30, 128, %s479_s6, %s464_s22  }
 0x14d PF: > { %p554_p4 = scmp.ge.s32.totalorder %s656_s21, 2  ;;  %s490_s14 = sand.u32 1, %s644_s18  }
 0x14e   : > { %s491_s17 = scalar_lea.sflag [#allocation3], %s490_s14 }
 0x14f   : > { %p551_p7 = pnand %p554_p4, %p730_p6 }
 0x151   : > { %p552_p8 = pneg %p551_p7 }
 0x153   : > { %639 = dma.done.wait (%p552_p8), %s491_s17, 128  }
 0x154   : > { %641 = vsyncadd (%p552_p8), %s491_s17, 4294967168  ;;  %p15_p9 = scmp.ge.s32.totalorder %s713_s24, 4   ;;  %s1080_s18 = smov %s648_s19 }
 0x155   : > { %s1081_s19 = smov %s652_s20  ;;  %s1082_s20 = smov %s724_s27 }
 0x156   : > { %s1083_s21 = smov %s713_s24  ;;  %17 = sbr.rel (!%p15_p9) target bundleno = 3 (0x3), region = 75 }
 0x15b   :  { %497 = vsyncpa [#allocation3], 1 }
 0x15c   :  { %499 = vsyncpa [#allocation3 + $0x1], 1 }

</bundles_post_ra>
